<compile_context>
chip_gen: v7x
topology: tpu7x:2x2x1
jax: 0.10.0
libtpu: 0.0.40
codegen_flags: <defaults>
</compile_context>

<pallas_src>
import jax
import jax.numpy as jnp
from jax.experimental import pallas as pl
from jax.experimental.pallas import tpu as pltpu


def _softmax_inst_head_kernel(score_ref, kw_ref, enc_ref, w_ref, b_ref,
                              out_ref, kvec_ref):
    se_idx = pl.program_id(1)

    # ---- per-batch kernel vector: compute once (first Se tile), persist in scratch ----
    @pl.when(se_idx == 0)
    def _():
        score = score_ref[0]                                           # (1, Sv)
        m = jnp.max(score, axis=-1, keepdims=True)                     # (1, 1)
        e = jnp.exp(score - m)                                         # EUP
        p = e / jnp.sum(e, axis=-1, keepdims=True)                     # softmax, (1, Sv)

        # attention-pool the kernel weights: sum_s kw[:, s] * p[s]  -> (Cin, 1)
        kvec = jnp.sum(kw_ref[0] * p, axis=-1, keepdims=True)          # VPU mul + XLU reduce

        # kernel_trans: 1x1 conv == (Cout, Cin) @ (Cin, 1) + b
        k = jnp.dot(w_ref[...], kvec,
                    preferred_element_type=jnp.float32) + b_ref[...]   # (Cout, 1)
        kvec_ref[...] = k

    # ---- broadcast-multiply against this encode_feat tile (NCHW layout: C x spatial) ----
    out_ref[0] = (kvec_ref[...] * enc_ref[0]).astype(out_ref.dtype)


def _pick_se_tile(se, cout, cap=2048, vmem_budget_bytes=8 << 20):
    """Largest lane-aligned (multiple-of-128) divisor of Se, capped so that the
    double-buffered enc + out tiles stay well inside VMEM; else full Se."""
    # 2 arrays (enc in, out) x 2 buffers x Cout x TSe x 4 bytes must fit the budget.
    vmem_cap = max(128, vmem_budget_bytes // (4 * 4 * max(cout, 1)))
    cap = min(cap, vmem_cap)
    if se <= cap:
        return se
    if se % 128 != 0:
        return se                      # can't tile lane-aligned; take the full row
    t = (cap // 128) * 128
    while t >= 128:
        if se % t == 0:
            return t
        t -= 128
    return se


def softmax_inst_head(soft_score, kernel_weight, encode_feat, w, b, *, tse_cap=2048):
    """soft_score (B,1,Hs,Ws), kernel_weight (B,Cin,Hk,Wk), encode_feat (B,Cout,H,W) NCHW.
    w (Cout, Cin), b (Cout,) are the kernel_trans 1x1-conv parameters."""
    B = soft_score.shape[0]
    _, Cin, Hk, Wk = kernel_weight.shape
    _, Cout, H, W = encode_feat.shape
    Sv = Hk * Wk
    Se = H * W
    assert int(soft_score.size) // B == Sv, "score spatial size must match kernel_weight"
    assert w.shape == (Cout, Cin) and b.shape == (Cout,)

    # Free NCHW reshapes (no transposes, no concat).
    score = soft_score.reshape(B, 1, Sv).astype(jnp.float32)
    kw = kernel_weight.reshape(B, Cin, Sv).astype(jnp.float32)
    enc = encode_feat.reshape(B, Cout, Se)
    w32 = w.astype(jnp.float32)
    b2 = b.reshape(Cout, 1).astype(jnp.float32)

    TSe = _pick_se_tile(Se, Cout, tse_cap)
    n_se = Se // TSe

    cost = pl.CostEstimate(
        flops=B * (2 * Cin * Sv + 2 * Cout * Cin + Cout * Se),
        transcendentals=B * Sv,
        bytes_accessed=4 * (B * Sv + B * Cin * Sv + 2 * B * Cout * Se + Cout * Cin + Cout),
    )

    out = pl.pallas_call(
        _softmax_inst_head_kernel,
        out_shape=jax.ShapeDtypeStruct((B, Cout, Se), encode_feat.dtype),
        grid_spec=pltpu.PrefetchScalarGridSpec(
            num_scalar_prefetch=0,
            grid=(B, n_se),
            in_specs=[
                pl.BlockSpec((1, 1, Sv), lambda bi, si: (bi, 0, 0)),        # score
                pl.BlockSpec((1, Cin, Sv), lambda bi, si: (bi, 0, 0)),      # kernel_weight
                pl.BlockSpec((1, Cout, TSe), lambda bi, si: (bi, 0, si)),   # encode_feat tile
                pl.BlockSpec((Cout, Cin), lambda bi, si: (0, 0)),           # kernel_trans W
                pl.BlockSpec((Cout, 1), lambda bi, si: (0, 0)),             # kernel_trans b
            ],
            out_specs=pl.BlockSpec((1, Cout, TSe), lambda bi, si: (bi, 0, si)),
            scratch_shapes=[pltpu.VMEM((Cout, 1), jnp.float32)],            # per-batch kernel vec
        ),
        compiler_params=pltpu.CompilerParams(
            dimension_semantics=("parallel", "arbitrary"),
            vmem_limit_bytes=64 << 20,
        ),
        cost_estimate=cost,
    )(score, kw, enc, w32, b2)

    return out.reshape(B, Cout, H, W)


def _reference(soft_score, kernel_weight, encode_feat, w, b):
    """Pure-JAX reference of the same forward pass."""
    B = soft_score.shape[0]
    _, Cin, Hk, Wk = kernel_weight.shape
    score = soft_score.reshape(B, 1, -1)
    score = jax.nn.softmax(score, axis=-1)
    kw = kernel_weight.reshape(B, Cin, -1)
    kernel = (kw * score).sum(-1)                     # (B, Cin)
    kernel = kernel @ w.T + b                         # (B, Cout)
    return kernel[:, :, None, None] * encode_feat


if __name__ == "__main__":
    # Module defaults: input_dim=256, output_dim=64.  Small spatial sizes.
    B, Cin, Cout = 2, 256, 64
    Hk = Wk = 8            # soft_score / kernel_weight spatial (Sv = 64)
    H = W = 32             # encode_feat spatial (Se = 1024)

    key = jax.random.PRNGKey(0)
    k1, k2, k3, k4, k5 = jax.random.split(key, 5)
    soft_score = jax.random.normal(k1, (B, 1, Hk, Wk), jnp.float32)
    kernel_weight = jax.random.normal(k2, (B, Cin, Hk, Wk), jnp.float32)
    encode_feat = jax.random.normal(k3, (B, Cout, H, W), jnp.float32)
    w = 0.05 * jax.random.normal(k4, (Cout, Cin), jnp.float32)
    b = 0.05 * jax.random.normal(k5, (Cout,), jnp.float32)

    out = softmax_inst_head(soft_score, kernel_weight, encode_feat, w, b, tse_cap=512)
    out = jax.block_until_ready(out)

    ref = _reference(soft_score, kernel_weight, encode_feat, w, b)
    assert out.shape == (B, Cout, H, W)
    assert jnp.allclose(out, ref, rtol=1e-3, atol=1e-3), float(jnp.max(jnp.abs(out - ref)))

    print("KERNEL_OK")
</pallas_src>

<mosaic_0001>
module attributes {stable_mosaic.version = 11 : i64} {
  func.func @_softmax_inst_head_kernel(%arg0: i32, %arg1: i32, %arg2: memref<1x1x64xf32, #tpu.memory_space<vmem>>, %arg3: memref<1x256x64xf32, #tpu.memory_space<vmem>>, %arg4: memref<1x64x512xf32, #tpu.memory_space<vmem>>, %arg5: memref<64x256xf32, #tpu.memory_space<vmem>>, %arg6: memref<64x1xf32, #tpu.memory_space<vmem>>, %arg7: memref<1x64x512xf32, #tpu.memory_space<vmem>>, %arg8: memref<64x1xf32, #tpu.memory_space<vmem>>) attributes {dimension_semantics = [#tpu.dimension_semantics<parallel>, #tpu.dimension_semantics<arbitrary>], iteration_bounds = array<i64: 2, 2>, scalar_prefetch = 0 : i64, scratch_operands = 1 : i64, tpu.core_type = #tpu.core_type<tc>, window_params = [{transform_indices = @transform_0, window_bounds = array<i64: 1, 1, 64>}, {transform_indices = @transform_1, window_bounds = array<i64: 1, 256, 64>}, {transform_indices = @transform_2, window_bounds = array<i64: 1, 64, 512>}, {pipeline_mode = #tpu.pipeline_mode<synchronous>, transform_indices = @transform_3, window_bounds = array<i64: 64, 256>}, {pipeline_mode = #tpu.pipeline_mode<synchronous>, transform_indices = @transform_4, window_bounds = array<i64: 64, 1>}, {transform_indices = @transform_5, window_bounds = array<i64: 1, 64, 512>}]} {
    %c0_i32 = arith.constant 0 : i32
    %0 = arith.cmpi eq, %arg1, %c0_i32 : i32
    %1 = arith.extui %0 : i1 to i32
    %c0_i32_0 = arith.constant 0 : i32
    %2 = arith.cmpi ne, %1, %c0_i32_0 : i32
    scf.if %2 {
      %c0_8 = arith.constant 0 : index
      %c0_9 = arith.constant 0 : index
      %c0_10 = arith.constant 0 : index
      %11 = vector.load %arg2[%c0_8, %c0_9, %c0_10] : memref<1x1x64xf32, #tpu.memory_space<vmem>>, vector<1x1x64xf32>
      %12 = vector.shape_cast %11 : vector<1x1x64xf32> to vector<1x64xf32>
      %cst = arith.constant dense<0xFF800000> : vector<1xf32>
      %13 = vector.multi_reduction <maximumf>, %12, %cst [1] : vector<1x64xf32> to vector<1xf32>
      %14 = vector.shape_cast %13 : vector<1xf32> to vector<1x1xf32>
      %15 = vector.broadcast %14 : vector<1x1xf32> to vector<1x64xf32>
      %16 = arith.subf %12, %15 : vector<1x64xf32>
      %17 = math.exp %16 : vector<1x64xf32>
      %cst_11 = arith.constant dense<0.000000e+00> : vector<1xf32>
      %18 = vector.multi_reduction <add>, %17, %cst_11 [1] : vector<1x64xf32> to vector<1xf32>
      %19 = vector.shape_cast %18 : vector<1xf32> to vector<1x1xf32>
      %20 = vector.broadcast %19 : vector<1x1xf32> to vector<1x64xf32>
      %21 = arith.divf %17, %20 : vector<1x64xf32>
      %c0_12 = arith.constant 0 : index
      %c0_13 = arith.constant 0 : index
      %c0_14 = arith.constant 0 : index
      %22 = vector.load %arg3[%c0_12, %c0_13, %c0_14] : memref<1x256x64xf32, #tpu.memory_space<vmem>>, vector<1x256x64xf32>
      %23 = vector.shape_cast %22 : vector<1x256x64xf32> to vector<256x64xf32>
      %24 = vector.broadcast %21 : vector<1x64xf32> to vector<256x64xf32>
      %25 = arith.mulf %23, %24 : vector<256x64xf32>
      %cst_15 = arith.constant dense<0.000000e+00> : vector<256xf32>
      %26 = vector.multi_reduction <add>, %25, %cst_15 [1] : vector<256x64xf32> to vector<256xf32>
      %27 = vector.shape_cast %26 : vector<256xf32> to vector<256x1xf32>
      %c0_16 = arith.constant 0 : index
      %c0_17 = arith.constant 0 : index
      %28 = vector.load %arg5[%c0_16, %c0_17] : memref<64x256xf32, #tpu.memory_space<vmem>>, vector<64x256xf32>
      %cst_18 = arith.constant dense<0.000000e+00> : vector<64x1xf32>
      %29 = tpu.matmul %28, %27, %cst_18 {dimension_numbers = #tpu.dot_dimension_numbers<[1], [0], [0], [1], [0, 0, 1, 1], [], []>} : vector<64x256xf32>, vector<256x1xf32>, vector<64x1xf32> -> vector<64x1xf32>
      %c0_19 = arith.constant 0 : index
      %c0_20 = arith.constant 0 : index
      %30 = vector.load %arg6[%c0_19, %c0_20] : memref<64x1xf32, #tpu.memory_space<vmem>>, vector<64x1xf32>
      %31 = arith.addf %29, %30 : vector<64x1xf32>
      %c0_21 = arith.constant 0 : index
      %c0_22 = arith.constant 0 : index
      %32 = vector.load %arg8[%c0_21, %c0_22] : memref<64x1xf32, #tpu.memory_space<vmem>>, vector<64x1xf32>
      tpu.vector_store %arg8[%c0_21, %c0_22], %31 {strides = array<i32>} : memref<64x1xf32, #tpu.memory_space<vmem>>, vector<64x1xf32>,
    } else {
    }
    %c0 = arith.constant 0 : index
    %c0_1 = arith.constant 0 : index
    %3 = vector.load %arg8[%c0, %c0_1] : memref<64x1xf32, #tpu.memory_space<vmem>>, vector<64x1xf32>
    %c0_2 = arith.constant 0 : index
    %c0_3 = arith.constant 0 : index
    %c0_4 = arith.constant 0 : index
    %4 = vector.load %arg4[%c0_2, %c0_3, %c0_4] : memref<1x64x512xf32, #tpu.memory_space<vmem>>, vector<1x64x512xf32>
    %5 = vector.shape_cast %4 : vector<1x64x512xf32> to vector<64x512xf32>
    %6 = vector.broadcast %3 : vector<64x1xf32> to vector<64x512xf32>
    %7 = arith.mulf %6, %5 : vector<64x512xf32>
    %c0_5 = arith.constant 0 : index
    %c0_6 = arith.constant 0 : index
    %c0_7 = arith.constant 0 : index
    %8 = vector.load %arg7[%c0_5, %c0_6, %c0_7] : memref<1x64x512xf32, #tpu.memory_space<vmem>>, vector<1x64x512xf32>
    %9 = vector.shape_cast %8 : vector<1x64x512xf32> to vector<64x512xf32>
    %10 = vector.shape_cast %7 : vector<64x512xf32> to vector<1x64x512xf32>
    tpu.vector_store %arg7[%c0_5, %c0_6, %c0_7], %10 {strides = array<i32>} : memref<1x64x512xf32, #tpu.memory_space<vmem>>, vector<1x64x512xf32>,
    return
  }
  func.func @transform_0(%arg0: i32, %arg1: i32) -> (i32, i32, i32) {
    %c0_i32 = arith.constant 0 : i32
    %c0_i32_0 = arith.constant 0 : i32
    %c0_i32_1 = arith.constant 0 : i32
    return %arg0, %c0_i32, %c0_i32_0 : i32, i32, i32
  }
  func.func @transform_1(%arg0: i32, %arg1: i32) -> (i32, i32, i32) {
    %c0_i32 = arith.constant 0 : i32
    %c0_i32_0 = arith.constant 0 : i32
    %c0_i32_1 = arith.constant 0 : i32
    return %arg0, %c0_i32, %c0_i32_0 : i32, i32, i32
  }
  func.func @transform_2(%arg0: i32, %arg1: i32) -> (i32, i32, i32) {
    %c0_i32 = arith.constant 0 : i32
    %c0_i32_0 = arith.constant 0 : i32
    return %arg0, %c0_i32, %arg1 : i32, i32, i32
  }
  func.func @transform_3(%arg0: i32, %arg1: i32) -> (i32, i32) {
    %c0_i32 = arith.constant 0 : i32
    %c0_i32_0 = arith.constant 0 : i32
    %c0_i32_1 = arith.constant 0 : i32
    return %c0_i32, %c0_i32_0 : i32, i32
  }
  func.func @transform_4(%arg0: i32, %arg1: i32) -> (i32, i32) {
    %c0_i32 = arith.constant 0 : i32
    %c0_i32_0 = arith.constant 0 : i32
    %c0_i32_1 = arith.constant 0 : i32
    return %c0_i32, %c0_i32_0 : i32, i32
  }
  func.func @transform_5(%arg0: i32, %arg1: i32) -> (i32, i32, i32) {
    %c0_i32 = arith.constant 0 : i32
    %c0_i32_0 = arith.constant 0 : i32
    return %arg0, %c0_i32, %arg1 : i32, i32, i32
  }
}

</mosaic_0001>

<bundles_post_ra>
// kernel: tpu_custom_call.1
= control target key start
LH: loop header
LB: loop body
LE: loop exit
PB: predicated region body
PF: predicated region fallthrough
CT: control target
= control target key end

     0   :  { %s2171_s0 = inlined_call_operand.hbm [shape: f32[2,1,64], index: 0, kind: input, shape index: {}]   ;;  %s2172_s1 = inlined_call_operand.hbm [shape: f32[2,256,64], index: 1, kind: input, shape index: {}]   ;;  %s2173_s2 = inlined_call_operand.hbm [shape: f32[2,64,1024], index: 2, kind: input, shape index: {}]   ;;  %s2174_s3 = inlined_call_operand.hbm [shape: f32[64,256], index: 3, kind: input, shape index: {}]   ;;  %s2175_s4 = inlined_call_operand.hbm [shape: f32[64,1], index: 4, kind: input, shape index: {}]   ;;  %s2176_s5 = inlined_call_operand.hbm [shape: f32[2,64,1024], index: 5, kind: output, shape index: {}]  }
   0x1   :  { %2195 = sst [smem:[#allocation24_spill]] %s2172_s1 }
   0x2   :  { %2196 = sst [smem:[#allocation25_spill]] %s2174_s3 }
   0x3   :  { %2197 = sst [smem:[#allocation26_spill]] %s2176_s5 }
   0x4   :  { %10 = vsyncpa [#allocation4], 0 }
   0x5   :  { %12 = vsyncpa [#allocation4 + $0x1], 0 }
   0x6   :  { %13 = vsyncpa [#allocation7], 0 }
   0x7   :  { %15 = vsyncpa [#allocation7 + $0x1], 0 }
   0x8   :  { %16 = vsyncpa [#allocation10], 0 }
   0x9   :  { %17 = vsyncpa [#allocation5], 0 }
   0xa   :  { %19 = vsyncpa [#allocation5 + $0x1], 0  ;;  %s1605_s18 = smov 0   ;;  %s1607_s19 = smov 0  }
   0xb   :  { %s1609_s20 = smov 0   ;;  %s1611_s21 = smov 0  }
   0xc   :  { %s1613_s22 = smov 0   ;;  %s1615_s23 = smov 0  }
   0xd   :  { %s1617_s24 = smov 0   ;;  %s1619_s25 = smov 0  }
   0xe   :  { %s1621_s26 = smov 0   ;;  %s1623_s27 = smov 0  }
   0xf   :  { %s1625_s28 = smov 0  }
  0x10 LB: > { %2198 = sst [smem:[#allocation18_spill]] %s1516_s18  ;;  %s1659_s29 = sadd.s32 4294967295, %s1556_s28   ;;  %s1556_s28 = sphi %s1625_s28, %s25_s28   ;;  %s1552_s27 = sphi %s1623_s27, %s2249_s27   ;;  %s1548_s26 = sphi %s1621_s26, %s2248_s26   ;;  %s1544_s25 = sphi %s1619_s25, %s2247_s25   ;;  %s1540_s24 = sphi %s1617_s24, %s2246_s24   ;;  %s1536_s23 = sphi %s1615_s23, %s2245_s23   ;;  %s1532_s22 = sphi %s1613_s22, %s2244_s22   ;;  %s1528_s21 = sphi %s1611_s21, %s2243_s21   ;;  %s1524_s20 = sphi %s1609_s20, %s2242_s20   ;;  %s1520_s19 = sphi %s1607_s19, %s2241_s19   ;;  %s1516_s18 = sphi %s1605_s18, %s2240_s18  }
  0x11   : > { %2199 = sst [smem:[#allocation19_spill]] %s1540_s24  ;;  %s995_s30 = sadd.s32 4294967294, %s1556_s28  }
  0x12   : > { %2200 = sst [smem:[#allocation20_spill]] %s1544_s25  ;;  %p57_p0 = scmp.ne.s32.totalorder %s1532_s22, %s1528_s21 }
  0x13   : > { %2201 = sst [smem:[#allocation21_spill]] %s1556_s28  ;;  %p2179_p1 = scmp.eq.s32.totalorder %s1659_s29, 0 }
  0x14   : > { %p2180_p2 = scmp.ne.s32.totalorder %s1524_s20, %s1520_s19  ;;  %p111_p4 = scmp.ne.s32.totalorder %s1520_s19, %s1516_s18 }
  0x15   : > { %p1669_p3 = por %p2179_p1, %p57_p0  ;;  %p179_p5 = scmp.eq.s32.totalorder %s1659_s29, 3 }
  0x16   : > { %p185_p6 = scmp.eq.s32.totalorder %s995_s30, 3  ;;  %p1678_p7 = por %p111_p4, %p2179_p1 }
  0x17   : > { %s2202_s7 = scalar_select %p1669_p3, 1, 0 }
  0x18   : > { %s2203_s8 = scalar_select %p1678_p7, 1, 0 }
  0x19   : > { %p996_p8 = scmp.ge.s32.totalorder %s1556_s28, 1  ;;  %p1686_p9 = por %p179_p5, %p2180_p2 }
  0x1a   : > { %p1690_p10 = por %p185_p6, %p111_p4  ;;  %p192_p11 = scmp.lt.s32.totalorder %s1556_s28, 5 }
  0x1b   : > { %s2204_s9 = scalar_select %p1686_p9, 1, 0 }
  0x1c   : > { %s2206_s10 = scalar_select %p1690_p10, 1, 0 }
  0x1d   : > { %2205 = sst [smem:[#allocation22_spill]] %s2204_s9  ;;  %p1695_p12 = pnand %p996_p8, %p192_p11 }
  0x1e   : > { %2207 = sst [smem:[#allocation23_spill]] %s2206_s10  ;;  %s1558_s12 = smov [#allocation9]  }
  0x1f   : > { %s2208_s11 = scalar_select %p1695_p12, 1, 0 }
  0x20   : > { %s204_s13 = sshll.u32 %s1558_s12, 4  ;;  %p1142_p13 = pneg %p1695_p12  ;;  %s205_s13 = int_to_ptr.vmem [resolvable:$true] %s204_s13 }
  0x21   : > { %s2210_s3 = sld [smem:[#allocation25_spill]] }
  0x22   : > { %p1703_p0 = pnand %p1142_p13, %p2179_p1 }
  0x24   : > { %p2189_p5 = pneg %p1703_p0 }
  0x27   : > { %s1276_s30 = scalar_lea.hbm %s2210_s3, 2048 }
  0x28   : > { %p1277_p4 = scmp.ne.s32.totalorder %s2210_s3, %s1276_s30  ;;  %p1283_p11 = scmp.lt.u32.totalorder %s1276_s30, %s2210_s3 }
  0x2a   : > { %p1279_p6 = pnand %p2189_p5, %p1277_p4 }
  0x2c   : > { %p1280_p8 = pneg %p1279_p6 }
  0x2e   : > { %p1285_p13 = pnand %p1283_p11, %p1280_p8 }
  0x30   : > { %1288 = shalt.err (!%p1285_p13)
}
  0x31   : > { %s1289_s16 = scalar_lea.vmem %s205_s13, 2048  ;;  %p1297_p9 = scmp.lt.s32.totalorder %s205_s13, %s205_s13 }
  0x32   : > { %p1290_p1 = scmp.ne.s32.totalorder %s205_s13, %s1289_s16  ;;  %p1298_p7 = scmp.lt.s32.totalorder %s1289_s16, %s1289_s16 }
  0x34   : > { %p1292_p2 = pnand %p1290_p1, %p2189_p5  ;;  %p1299_p3 = por %p1298_p7, %p1297_p9 }
  0x36   : > { %p1293_p10 = pneg %p1292_p2 }
  0x38   : > { %p1300_p12 = pnand %p1299_p3, %p1293_p10 }
  0x3a   : > { %1303 = shalt.err (!%p1300_p12)
}
  0x3b   : > { %s1559_s6 = smov 256   ;;  %s1560_s18 = smov 16  }
  0x3c   : > { %1145 = dma.hbm_to_vmem [thread:$0]  (!%p1703_p0), %s2210_s3, 2048, %s205_s13, [#allocation10], %s1559_s6, %s1559_s6, %s1560_s18  }
  0x3d   : > { %p51_p1 = scmp.ne.s32.totalorder %s1536_s23, %s1532_s22  ;;  %p52_p2 = scmp.eq.s32.totalorder %s1556_s28, 0 }
  0x3e   : > { %p2211_p7 = scmp.ne.s32.totalorder %s1524_s20, %s1520_s19  ;;  %p1165_p10 = scmp.lt.s32.totalorder %s1556_s28, 4 }
  0x3f   : > { %p53_p3 = por %p52_p2, %p51_p1  ;;  %s1739_s16 = sand.u32 1, %s1536_s23  }
  0x40   : > { %p107_p9 = por %p2211_p7, %p52_p2  ;;  %s248_s21 = sand.u32 1, %s1556_s28  }
  0x41   : > { %s1001_s30 = sshll.u32 %s1739_s16, 8  ;;  %p1743_p12 = pnand %p1165_p10, %p53_p3 }
  0x42   : > { %s1021_s15 = sshll.u32 %s1552_s27, 12  ;;  %s2213_s1 = sld [smem:[#allocation24_spill]] }
  0x43   : > { %s2212_s12 = scalar_select %p1743_p12, 1, 0 }
  0x44   : > { %s252_s18 = scalar_lea.vmem [#allocation6], %s1001_s30  ;;  %p1753_p4 = pnand %p1165_p10, %p107_p9 }
  0x45   : > { %s259_s17 = sshll.u32 %s252_s18, 4  ;;  %s1759_s28 = scalar_lea.sflag [#allocation7], %s248_s21  ;;  %s1757_s17 = int_to_ptr.vmem [resolvable:$true] %s259_s17 }
  0x46   : > { %s2214_s3 = scalar_select %p1753_p4, 1, 0 }
  0x47   : > { %p2192_p8 = pneg %p1743_p12 }
  0x48   : > { %s1751_s6 = scalar_lea.hbm %s2213_s1, %s1021_s15  ;;  %s1309_s30 = scalar_lea.hbm %s2213_s1, 8192 }
  0x49   : > { %s1304_s9 = scalar_lea.hbm %s1751_s6, 4096  ;;  %p1310_p1 = scmp.lt.u32.totalorder %s1751_s6, %s2213_s1 }
  0x4a   : > { %p1305_p6 = scmp.ne.s32.totalorder %s1751_s6, %s1304_s9  ;;  %p1311_p2 = scmp.lt.u32.totalorder %s1309_s30, %s1304_s9 }
  0x4b   : > { %p1313_p7 = scmp.lt.u32.totalorder %s1304_s9, %s1751_s6 }
  0x4c   : > { %p1307_p11 = pnand %p2192_p8, %p1305_p6  ;;  %p1312_p3 = por %p1311_p2, %p1310_p1 }
  0x4e   : > { %p1308_p13 = pneg %p1307_p11  ;;  %p1314_p9 = por %p1313_p7, %p1312_p3 }
  0x50   : > { %p1315_p10 = pnand %p1314_p9, %p1308_p13 }
  0x52   : > { %1318 = shalt.err (!%p1315_p10)
}
  0x53   : > { %s1319_s21 = scalar_lea.vmem %s1757_s17, 4096  ;;  %s1561_s15 = smov [#allocation6]  }
  0x54   : > { %p1320_p6 = scmp.ne.s32.totalorder %s1757_s17, %s1319_s21  ;;  %s1324_s10 = sshll.u32 %s1561_s15, 4  ;;  %s1325_s10 = int_to_ptr.vmem [resolvable:$false] %s1324_s10 }
  0x55   : > { %s1326_s13 = scalar_lea.vmem %s1325_s10, 8192  ;;  %p1327_p4 = scmp.lt.s32.totalorder %s1757_s17, %s1325_s10 }
  0x56   : > { %p1322_p11 = pnand %p1320_p6, %p2192_p8  ;;  %p1328_p1 = scmp.lt.s32.totalorder %s1326_s13, %s1319_s21 }
  0x58   : > { %p1323_p5 = pneg %p1322_p11  ;;  %p1329_p2 = por %p1328_p1, %p1327_p4 }
  0x5a   : > { %p1330_p3 = pnand %p1329_p2, %p1323_p5 }
  0x5c   : > { %1333 = shalt.err (!%p1330_p3)
}
  0x5d   : > { %s1562_s9 = smov 128   ;;  %s1563_s30 = smov 8  }
  0x5e   : > { %1155 = dma.hbm_to_vmem [thread:$0]  (!%p1743_p12), %s1751_s6, 4096, %s1757_s17, %s1759_s28, %s1562_s9, %s1562_s9, %s1563_s30  }
  0x5f   : > { %s1564_s18 = smov [#allocation11]   ;;  %s1334_s10 = scalar_lea.hbm %s2175_s4, 1024 }
  0x60   : > { %s217_s1 = sshll.u32 %s1564_s18, 4  ;;  %p1335_p5 = scmp.ne.s32.totalorder %s2175_s4, %s1334_s10  ;;  %s218_s1 = int_to_ptr.vmem [resolvable:$true] %s217_s1 }
  0x61   : > { %p2215_p4 = pneg %p1703_p0  ;;  %p1341_p9 = scmp.lt.u32.totalorder %s1334_s10, %s2175_s4 }
  0x63   : > { %p1337_p13 = pnand %p1335_p5, %p2215_p4 }
  0x65   : > { %p1338_p7 = pneg %p1337_p13 }
  0x67   : > { %p1343_p10 = pnand %p1341_p9, %p1338_p7 }
  0x69   : > { %1346 = shalt.err (!%p1343_p10)
}
  0x6a   : > { %s1347_s6 = scalar_lea.vmem %s218_s1, 1024  ;;  %p2216_p11 = pmov %p2215_p4 }
  0x6b   : > { %p1348_p6 = scmp.ne.s32.totalorder %s218_s1, %s1347_s6  ;;  %p1355_p3 = scmp.lt.s32.totalorder %s218_s1, %s218_s1 }
  0x6c   : > { %p1356_p8 = scmp.lt.s32.totalorder %s1347_s6, %s1347_s6 }
  0x6d   : > { %p1350_p1 = pnand %p1348_p6, %p2216_p11 }
  0x6e   : > { %p1357_p12 = por %p1356_p8, %p1355_p3 }
  0x6f   : > { %p1351_p2 = pneg %p1350_p1 }
  0x71   : > { %p1358_p4 = pnand %p1357_p12, %p1351_p2 }
  0x73   : > { %1361 = shalt.err (!%p1358_p4)
}
  0x74   : > { %1148 = dma.hbm_to_vmem [thread:$0]  (!%p1703_p0), %s2175_s4, 1024, %s218_s1, [#allocation10], %s1562_s9, %s1562_s9, %s1563_s30  }
  0x75   : > { %s1000_s24 = sshll.u32 %s1552_s27, 4  ;;  %s234_s10 = scalar_lea.vmem [#allocation3], %s1739_s16 }
  0x76   : > { %s1811_s15 = scalar_lea.hbm %s2171_s0, %s1000_s24  ;;  %s241_s14 = sshll.u32 %s234_s10, 4  ;;  %s242_s14 = int_to_ptr.vmem [resolvable:$true] %s241_s14 }
  0x77   : > { %s232_s21 = scalar_lea.sflag [#allocation4], %s1739_s16  ;;  %s1362_s13 = scalar_lea.hbm %s1811_s15, 16 }
  0x78   : > { %p1363_p12 = scmp.ne.s32.totalorder %s1811_s15, %s1362_s13  ;;  %p2217_p8 = scmp.ne.s32.totalorder %s2212_s12, 0 }
  0x79   : > { %s1367_s30 = scalar_lea.hbm %s2171_s0, 32  ;;  %p1368_p7 = scmp.lt.u32.totalorder %s1811_s15, %s2171_s0 }
  0x7a   : > { %p2218_p5 = pneg %p2217_p8  ;;  %p1369_p9 = scmp.lt.u32.totalorder %s1367_s30, %s1362_s13 }
  0x7b   : > { %p1371_p6 = scmp.lt.u32.totalorder %s1362_s13, %s1811_s15 }
  0x7c   : > { %p1365_p13 = pnand %p1363_p12, %p2218_p5  ;;  %p1370_p10 = por %p1369_p9, %p1368_p7 }
  0x7e   : > { %p1366_p0 = pneg %p1365_p13  ;;  %p1372_p11 = por %p1371_p6, %p1370_p10 }
  0x80   : > { %p1373_p1 = pnand %p1372_p11, %p1366_p0 }
  0x82   : > { %1376 = shalt.err (!%p1373_p1)
}
  0x83   : > { %s1377_s16 = scalar_lea.vmem %s242_s14, 16  ;;  %p2219_p3 = pmov %p2218_p5 }
  0x84   : > { %p1378_p2 = scmp.ne.s32.totalorder %s242_s14, %s1377_s16  ;;  %s1565_s17 = smov [#allocation3]  }
  0x85   : > { %s1382_s24 = sshll.u32 %s1565_s17, 4  ;;  %s1383_s24 = int_to_ptr.vmem [resolvable:$false] %s1382_s24 }
  0x86   : > { %p1380_p4 = pnand %p1378_p2, %p2219_p3  ;;  %s1384_s25 = scalar_lea.vmem %s1383_s24, 32 }
  0x87   : > { %p1385_p5 = scmp.lt.s32.totalorder %s242_s14, %s1383_s24  ;;  %p1386_p13 = scmp.lt.s32.totalorder %s1384_s25, %s1377_s16 }
  0x88   : > { %p1381_p12 = pneg %p1380_p4 }
  0x89   : > { %p1387_p7 = por %p1386_p13, %p1385_p5 }
  0x8b   : > { %p1388_p9 = pnand %p1387_p7, %p1381_p12 }
  0x8d   : > { %1391 = shalt.err (!%p1388_p9)
}
  0x8e   : > { %1152 = dma.hbm_to_vmem [thread:$0]  (!%p2217_p8), %s1811_s15, 16, %s242_s14, %s232_s21  }
  0x8f   : > { %s271_s18 = sand.u32 1, %s1524_s20   ;;  %s34_s10 = sadd.s32 1, %s1548_s26 }
  0x90   : > { %s1004_s13 = sshll.u32 %s271_s18, 8  ;;  %p35_p0 = scmp.ge.s32.totalorder %s34_s10, 2 }
  0x91   : > { %s1005_s1 = sshll.u32 %s1548_s26, 2  ;;  %s1006_s9 = sshll.u32 %s1552_s27, 6 }
  0x92   : > { %s2251_s10 = smov (%p35_p0, %s34_s10), 0  ;;  %s2220_s12 = sadd.s32 1, %s1552_s27 }
  0x93   : > { %s2253_s12 = smov (!%p35_p0, %s2220_s12), %s1552_s27  ;;  %s94_s30 = ssub.s32 %s1548_s26, %s2251_s10 }
  0x94   : > { %s279_s6 = sadd.s32 %s1006_s9, %s1005_s1  ;;  %p39_p8 = scmp.ge.s32.totalorder %s2253_s12, 2 }
  0x95   : > { %s1007_s15 = sshll.u32 %s279_s6, 7  ;;  %s273_s16 = scalar_lea.vmem [#allocation8], %s1004_s13 }
  0x96   : > { %s1848_s5 = scalar_lea.hbm %s2173_s2, %s1007_s15  ;;  %s282_s17 = sshll.u32 %s273_s16, 4  ;;  %s1852_s17 = int_to_ptr.vmem [resolvable:$true] %s282_s17 }
  0x97   : > { %s2255_s12 = smov (%p39_p8, %s2253_s12), 0  ;;  %s2221_s18 = sadd.s32 1, %s1536_s23 }
  0x98   : > { %s41_s24 = ssub.s32 %s1552_s27, %s2255_s12  ;;  %s2222_s9 = sadd.s32 1, %s1524_s20 }
  0x99   : > { %p42_p10 = scmp.eq.s32.totalorder %s41_s24, 0  ;;  %s95_s25 = sor.u32 %s94_s30, %s41_s24 }
  0x9a   : > { %p96_p6 = scmp.eq.s32.totalorder %s95_s25, 0  ;;  %s1392_s15 = scalar_lea.hbm %s1848_s5, 4096 }
  0x9b   : > { %s1859_s1 = scalar_select %p42_p10, %s1536_s23, %s2221_s18  }
  0x9c   : > { %s1864_s6 = scalar_select %p96_p6, %s1524_s20, %s2222_s9  }
  0x9d   : > { %p1393_p11 = scmp.ne.s32.totalorder %s1848_s5, %s1392_s15  ;;  %p2223_p1 = scmp.ne.s32.totalorder %s2214_s3, 0 }
  0x9e   : > { %s1397_s21 = scalar_lea.hbm %s2173_s2, 16384  ;;  %p1398_p12 = scmp.lt.u32.totalorder %s1848_s5, %s2173_s2 }
  0x9f   : > { %p1394_p2 = pneg %p2223_p1  ;;  %p1399_p5 = scmp.lt.u32.totalorder %s1397_s21, %s1392_s15 }
  0xa0   : > { %p1401_p7 = scmp.lt.u32.totalorder %s1392_s15, %s1848_s5 }
  0xa1   : > { %p1395_p3 = pnand %p1394_p2, %p1393_p11  ;;  %p1400_p13 = por %p1399_p5, %p1398_p12 }
  0xa3   : > { %p1396_p4 = pneg %p1395_p3  ;;  %p1402_p9 = por %p1401_p7, %p1400_p13 }
  0xa5   : > { %p1403_p0 = pnand %p1402_p9, %p1396_p4 }
  0xa7   : > { %1406 = shalt.err (!%p1403_p0)
}
  0xa8   : > { %s1407_s24 = scalar_lea.vmem %s1852_s17, 4096  ;;  %s1566_s25 = smov [#allocation8]  }
  0xa9   : > { %p1408_p8 = scmp.ne.s32.totalorder %s1852_s17, %s1407_s24  ;;  %s1412_s18 = sshll.u32 %s1566_s25, 4  ;;  %s1413_s18 = int_to_ptr.vmem [resolvable:$false] %s1412_s18 }
  0xaa   : > { %s1414_s9 = scalar_lea.vmem %s1413_s18, 8192  ;;  %p1415_p11 = scmp.lt.s32.totalorder %s1852_s17, %s1413_s18 }
  0xab   : > { %p1410_p10 = pnand %p1408_p8, %p1394_p2  ;;  %p1416_p3 = scmp.lt.s32.totalorder %s1414_s9, %s1407_s24 }
  0xad   : > { %p1411_p6 = pneg %p1410_p10  ;;  %p1417_p12 = por %p1416_p3, %p1415_p11 }
  0xaf   : > { %p1418_p5 = pnand %p1417_p12, %p1411_p6 }
  0xb1   : > { %1421 = shalt.err (!%p1418_p5)
}
  0xb2   : > { %s1567_s15 = smov 1024   ;;  %s1568_s13 = smov 512  }
  0xb3   : > { %s1569_s14 = smov 32   ;;  %p2224_p2 = scmp.ne.s32.totalorder %s2208_s11, 0 }
  0xb4   : > { %1158 = dma.hbm_to_vmem [thread:$0]  (!%p2223_p1), %s1848_s5, 4096, %s1852_s17, %s1759_s28, %s1567_s15, %s1568_s13, %s1569_s14  }
  0xb5   : > { %294 = sbr.rel (%p2224_p2) target bundleno = 1130 (0x46a), region = 40  ;;  %s296_s21 = sand.u32 (!%p2224_p2), 1, %s1532_s22  }
  0xb6   : > { %s297_s30 = scalar_lea.sflag (!%p2224_p2), [#allocation4], %s296_s21  ;;  %s299_s16 = scalar_lea.vmem (!%p2224_p2), [#allocation3], %s296_s21 }
  0xb7   : > { %p2225_p4 = scmp.ne.s32.totalorder (!%p2224_p2), %s2202_s7, 0 }
  0xbc   : > { %1495 = dma.done.wait (%p2225_p4), %s297_s30, 16  }
  0xbd   : > { %1497 = vsyncadd (%p2225_p4), %s297_s30, 4294967280  ;;  %s304_s24 = sand.u32 1, %s1659_s29   ;;  %s1009_s25 = sshll.u32 %s296_s21, 8 }
  0xbe   : > { %s305_s18 = scalar_lea.sflag [#allocation7], %s304_s24  ;;  %s1900_s3 = scalar_lea.vmem [#allocation6], %s1009_s25 }
  0xbf   : > { %1499 = dma.done.wait (%p2225_p4), %s305_s18, 4096  }
  0xc0   : > { %1501 = vsyncadd (%p2225_p4), %s305_s18, 4294963200  ;;  %s315_s28 = sand.u32 1, %s1520_s19   ;;  %p2226_p1 = scmp.ne.s32.totalorder %s2203_s8, 0 }
  0xc1   : > { %s1010_s11 = sshll.u32 %s315_s28, 8 }
  0xc2   : > { %s1909_s5 = scalar_lea.vmem [#allocation8], %s1010_s11 }
  0xc3   : > { %1503 = dma.done.wait (%p2226_p1), %s305_s18, 4096  }
  0xc4   : > { %1505 = vsyncadd (%p2226_p1), %s305_s18, 4294963200  ;;  %p2227_p13 = scmp.eq.s32.totalorder %s1659_s29, 0 }
  0xc6   : > { %1507 = dma.done.wait (%p2227_p13), [#allocation10], 3072   ;;  %p2228_p7 = pmov %p2227_p13 }
  0xc7   : > { %s1919_s7 = scalar_lea.vmem [#allocation12], %s1010_s11  ;;  %s2229_s17 = sld [smem:[#allocation19_spill]] }
  0xc8   : > { %1509 = vsyncadd (%p2228_p7), [#allocation10], 4294964224 }
  0xcd   : > { %p1014_p9 = scmp.ne.s32.totalorder %s2229_s17, 0 }
  0xce   : > { %v367_v0 = vld [vmem:[%s299_s16] sm:$0x1] (!%p1014_p9)  ;;  %vm368_vm0 = vcmask (!%p1014_p9), 516096   ;;  %v413_v8 = vlaneseq (!%p1014_p9)  ;;  %v396_v13 = vld [vmem:[%s1900_s3 + $0x80] sm:$0xff] (!%p1014_p9)  ;;  %vm450_vm1 = vcmask (!%p1014_p9), 523264   ;;  %v397_v16 = vld [vmem:[%s1900_s3 + $0x88] sm:$0xff] (!%p1014_p9) }
  0xcf   : > { %366 = sbr.rel (%p1014_p9) target bundleno = 967 (0x3c7), region = 64  ;;  %v369_v1 = vsel (!%p1014_p9), %vm368_vm0, %v367_v0, -inf  ;;  %v380_v14 = vld [vmem:[%s1900_s3] sm:$0xff] (!%p1014_p9)  ;;  %v398_v17 = vld [vmem:[%s1900_s3 + $0x90] sm:$0xff] (!%p1014_p9)  ;;  %v381_v24 = vld [vmem:[%s1900_s3 + $0x8] sm:$0xff] (!%p1014_p9)  ;;  %vm676_vm2 = vcmask (!%p1014_p9), 7168  }
  0xd0   : > { %370 = vmax.xlane.f32.xlu0 (!%p1014_p9), %v369_v1  ;;  %v414_v9 = vshrl.u32 (!%p1014_p9), %v413_v8, 7  ;;  %v382_v25 = vld [vmem:[%s1900_s3 + $0x10] sm:$0xff] (!%p1014_p9)  ;;  %v399_v30 = vld [vmem:[%s1900_s3 + $0x98] sm:$0xff] (!%p1014_p9)  ;;  %v400_v31 = vld [vmem:[%s1900_s3 + $0xa0] sm:$0xff] (!%p1014_p9) }
  0xd1   : > { %v395_v36 = vld [vmem:[%s1900_s3 + $0x78] sm:$0xff] (!%p1014_p9)  ;;  %v384_v38 = vld [vmem:[%s1900_s3 + $0x20] sm:$0xff] (!%p1014_p9)  ;;  %v401_v44 = vld [vmem:[%s1900_s3 + $0xa8] sm:$0xff] (!%p1014_p9) }
  0xd2   : > { %v415_v10 = vsub.s32 (!%p1014_p9), 0, %v414_v9  ;;  %v383_v37 = vld [vmem:[%s1900_s3 + $0x18] sm:$0xff] (!%p1014_p9)  ;;  %v402_v45 = vld [vmem:[%s1900_s3 + $0xb0] sm:$0xff] (!%p1014_p9)  ;;  %v385_v51 = vld [vmem:[%s1900_s3 + $0x28] sm:$0xff] (!%p1014_p9) }
  0xd3   : > { %v386_v52 = vld [vmem:[%s1900_s3 + $0x30] sm:$0xff] (!%p1014_p9)  ;;  %v403_v57 = vld [vmem:[%s1900_s3 + $0xb8] sm:$0xff] (!%p1014_p9)  ;;  %v404_v58 = vld [vmem:[%s1900_s3 + $0xc0] sm:$0xff] (!%p1014_p9) }
  0xd4   : > { %v387_v63 = vld [vmem:[%s1900_s3 + $0x38] sm:$0xff] (!%p1014_p9) }
 0x15d   : > { %v371_v2 = vpop.xlane.xlu0 %370 }
 0x15e   : > { %v372_v3 = vsub.f32 %v367_v0, %v371_v2  ;;  %v388_v0 = vld [vmem:[%s1900_s3 + $0x40] sm:$0xff] }
 0x160   : > { %v373_v4 = vmul.f32 1.442695, %v372_v3 }
 0x162   : > { %1270 = vpow2.f32 %v373_v4 }
 0x16c   : > { %v1271_v5 = vpop.eup %1270 }
 0x16d   : > { %v375_v6 = vsel %vm368_vm0, %v1271_v5, 0.0 }
 0x16e   : > { %376 = vadd.xlane.f32.xlu0 %v375_v6  ;;  %v406_v6 = vld [vmem:[%s1900_s3 + $0xd0] sm:$0xff] }
 0x1fb   : > { %v377_v7 = vpop.xlane.xlu0 %376 }
 0x1fc   : > { %1272 = vrcp.f32 %v377_v7 }
 0x206   : > { %v1273_v11 = vpop.eup %1272 }
 0x207   : > { %v379_v12 = vmul.f32 %v1273_v11, %v1271_v5  ;;  %v405_v5 = vld [vmem:[%s1900_s3 + $0xc8] sm:$0xff] }
 0x208   : > { %v389_v11 = vld [vmem:[%s1900_s3 + $0x48] sm:$0xff] }
 0x209   : > { %v1924_v15 = vrot.slane %v379_v12, %v415_v10  ;;  %v390_v12 = vld [vmem:[%s1900_s3 + $0x50] sm:$0xff] }
 0x20b   : > { %v434_v18 = vmul.f32 %v1924_v15, %v396_v13  ;;  %v418_v19 = vmul.f32 %v1924_v15, %v380_v14  ;;  %v435_v22 = vmul.f32 %v1924_v15, %v397_v16  ;;  %v436_v23 = vmul.f32 %v1924_v15, %v398_v17 }
 0x20c   : > { %v419_v28 = vmul.f32 %v1924_v15, %v381_v24  ;;  %v420_v29 = vmul.f32 %v1924_v15, %v382_v25  ;;  %v437_v34 = vmul.f32 %v1924_v15, %v399_v30  ;;  %v438_v35 = vmul.f32 %v1924_v15, %v400_v31  ;;  %v391_v24 = vld [vmem:[%s1900_s3 + $0x58] sm:$0xff]  ;;  %v392_v25 = vld [vmem:[%s1900_s3 + $0x60] sm:$0xff]  ;;  %v409_v30 = vld [vmem:[%s1900_s3 + $0xe8] sm:$0xff] }
 0x20d   : > { %v499_v20 = vsel %vm450_vm1, %v434_v18, 0.0  ;;  %v451_v21 = vsel %vm450_vm1, %v418_v19, 0.0  ;;  %v502_v26 = vsel %vm450_vm1, %v435_v22, 0.0  ;;  %v505_v27 = vsel %vm450_vm1, %v436_v23, 0.0  ;;  %v407_v18 = vld [vmem:[%s1900_s3 + $0xd8] sm:$0xff]  ;;  %v408_v19 = vld [vmem:[%s1900_s3 + $0xe0] sm:$0xff] }
 0x20e   : > { %500 = vadd.xlane.f32.xlu1 %v499_v20  ;;  %452 = vadd.xlane.f32.xlu0 %v451_v21  ;;  %v454_v32 = vsel %vm450_vm1, %v419_v28, 0.0  ;;  %v457_v33 = vsel %vm450_vm1, %v420_v29, 0.0  ;;  %v433_v39 = vmul.f32 %v1924_v15, %v395_v36  ;;  %v508_v40 = vsel %vm450_vm1, %v437_v34, 0.0  ;;  %v410_v31 = vld [vmem:[%s1900_s3 + $0xf0] sm:$0xff]  ;;  %v393_v36 = vld [vmem:[%s1900_s3 + $0x68] sm:$0xff] }
 0x20f   : > { %v511_v41 = vsel %vm450_vm1, %v438_v35, 0.0  ;;  %v421_v42 = vmul.f32 %v1924_v15, %v383_v37  ;;  %v422_v43 = vmul.f32 %v1924_v15, %v384_v38  ;;  %v439_v49 = vmul.f32 %v1924_v15, %v401_v44  ;;  %v394_v37 = vld [vmem:[%s1900_s3 + $0x70] sm:$0xff] }
 0x210   : > { %v1957_v46 = vsel %vm450_vm1, %v433_v39, 0.0  ;;  %v440_v50 = vmul.f32 %v1924_v15, %v402_v45  ;;  %v423_v55 = vmul.f32 %v1924_v15, %v385_v51  ;;  %v424_v56 = vmul.f32 %v1924_v15, %v386_v52 }
 0x211   : > { %v460_v47 = vsel %vm450_vm1, %v421_v42, 0.0  ;;  %v463_v48 = vsel %vm450_vm1, %v422_v43, 0.0  ;;  %v514_v53 = vsel %vm450_vm1, %v439_v49, 0.0  ;;  %v441_v61 = vmul.f32 %v1924_v15, %v403_v57  ;;  %v411_v42 = vld [vmem:[%s1900_s3 + $0xf8] sm:$0xff]  ;;  %v556_v49 = vld [vmem:[#allocation9 + $0x48] sm:$0xff] }
 0x212   : > { %503 = vadd.xlane.f32.xlu1 %v502_v26  ;;  %506 = vadd.xlane.f32.xlu0 %v505_v27  ;;  %v517_v54 = vsel %vm450_vm1, %v440_v50, 0.0  ;;  %v466_v59 = vsel %vm450_vm1, %v423_v55, 0.0  ;;  %v469_v60 = vsel %vm450_vm1, %v424_v56, 0.0  ;;  %v442_v62 = vmul.f32 %v1924_v15, %v404_v58 }
 0x213   : > { %v520_v1 = vsel %vm450_vm1, %v441_v61, 0.0  ;;  %v425_v3 = vmul.f32 %v1924_v15, %v387_v63  ;;  %v426_v4 = vmul.f32 %v1924_v15, %v388_v0  ;;  %v443_v9 = vmul.f32 %v1924_v15, %v405_v5  ;;  %655 = vmatprep.mubr.f32.mxu1 %v556_v49 }
 0x214   : > { %v523_v2 = vsel %vm450_vm1, %v442_v62, 0.0  ;;  %v444_v10 = vmul.f32 %v1924_v15, %v406_v6  ;;  %v427_v16 = vmul.f32 %v1924_v15, %v389_v11  ;;  %v428_v17 = vmul.f32 %v1924_v15, %v390_v12 }
 0x215   : > { %v472_v7 = vsel %vm450_vm1, %v425_v3, 0.0  ;;  %v475_v8 = vsel %vm450_vm1, %v426_v4, 0.0  ;;  %v526_v13 = vsel %vm450_vm1, %v443_v9, 0.0  ;;  %v445_v22 = vmul.f32 %v1924_v15, %v407_v18 }
 0x216   : > { %455 = vadd.xlane.f32.xlu1 %v454_v32  ;;  %458 = vadd.xlane.f32.xlu0 %v457_v33  ;;  %v529_v14 = vsel %vm450_vm1, %v444_v10, 0.0  ;;  %v478_v20 = vsel %vm450_vm1, %v427_v16, 0.0  ;;  %v481_v21 = vsel %vm450_vm1, %v428_v17, 0.0  ;;  %v446_v23 = vmul.f32 %v1924_v15, %v408_v19 }
 0x217   : > { %v532_v26 = vsel %vm450_vm1, %v445_v22, 0.0  ;;  %v429_v28 = vmul.f32 %v1924_v15, %v391_v24  ;;  %v430_v29 = vmul.f32 %v1924_v15, %v392_v25  ;;  %v447_v34 = vmul.f32 %v1924_v15, %v409_v30 }
 0x218   : > { %v535_v27 = vsel %vm450_vm1, %v446_v23, 0.0  ;;  %v448_v35 = vmul.f32 %v1924_v15, %v410_v31  ;;  %v449_v45 = vmul.f32 %v1924_v15, %v411_v42  ;;  %v559_v42 = vld [vmem:[#allocation9 + $0x60] sm:$0xff] }
 0x219   : > { %v484_v32 = vsel %vm450_vm1, %v429_v28, 0.0  ;;  %v487_v33 = vsel %vm450_vm1, %v430_v29, 0.0  ;;  %v538_v38 = vsel %vm450_vm1, %v447_v34, 0.0  ;;  %v555_v34 = vld [vmem:[#allocation9 + $0x40] sm:$0xff] }
 0x21a   : > { %509 = vadd.xlane.f32.xlu1 %v508_v40  ;;  %512 = vadd.xlane.f32.xlu0 %v511_v41  ;;  %v541_v39 = vsel %vm450_vm1, %v448_v35, 0.0  ;;  %v431_v40 = vmul.f32 %v1924_v15, %v393_v36  ;;  %v432_v41 = vmul.f32 %v1924_v15, %v394_v37  ;;  %v550_v35 = vld [vmem:[#allocation9 + $0x18] sm:$0xff]  ;;  %v549_v37 = vld [vmem:[#allocation9 + $0x10] sm:$0xff] }
 0x21b   : > { %v558_v36 = vld [vmem:[#allocation9 + $0x58] sm:$0xff] }
 0x21c   : > { %v490_v43 = vsel %vm450_vm1, %v431_v40, 0.0  ;;  %v493_v44 = vsel %vm450_vm1, %v432_v41, 0.0  ;;  %v560_v40 = vld [vmem:[#allocation9 + $0x68] sm:$0xff]  ;;  %v551_v41 = vld [vmem:[#allocation9 + $0x20] sm:$0xff] }
 0x21e   : > { %461 = vadd.xlane.f32.xlu1 %v460_v47  ;;  %464 = vadd.xlane.f32.xlu0 %v463_v48  ;;  %v544_v47 = vsel %vm450_vm1, %v449_v45, 0.0  ;;  %v548_v48 = vld [vmem:[#allocation9 + $0x8] sm:$0xff]  ;;  %v553_v45 = vld [vmem:[#allocation9 + $0x30] sm:$0xff] }
 0x21f   : > { %635 = vmatprep.mubr.f32.mxu0 %v548_v48 }
 0x222   : > { %515 = vadd.xlane.f32.xlu1 %v514_v53  ;;  %518 = vadd.xlane.f32.xlu0 %v517_v54 }
 0x226   : > { %467 = vadd.xlane.f32.xlu1 %v466_v59  ;;  %470 = vadd.xlane.f32.xlu0 %v469_v60 }
 0x22a   : > { %521 = vadd.xlane.f32.xlu1 %v520_v1  ;;  %524 = vadd.xlane.f32.xlu0 %v523_v2 }
 0x22e   : > { %473 = vadd.xlane.f32.xlu1 %v472_v7  ;;  %476 = vadd.xlane.f32.xlu0 %v475_v8 }
 0x232   : > { %527 = vadd.xlane.f32.xlu1 %v526_v13  ;;  %530 = vadd.xlane.f32.xlu0 %v529_v14 }
 0x236   : > { %479 = vadd.xlane.f32.xlu1 %v478_v20  ;;  %482 = vadd.xlane.f32.xlu0 %v481_v21 }
 0x23a   : > { %533 = vadd.xlane.f32.xlu1 %v532_v26  ;;  %536 = vadd.xlane.f32.xlu0 %v535_v27 }
 0x23e   : > { %485 = vadd.xlane.f32.xlu1 %v484_v32  ;;  %488 = vadd.xlane.f32.xlu0 %v487_v33  ;;  %v547_v33 = vld [vmem:[#allocation9] sm:$0xff] }
 0x242   : > { %539 = vadd.xlane.f32.xlu1 %v538_v38  ;;  %542 = vadd.xlane.f32.xlu0 %v541_v39  ;;  %v557_v38 = vld [vmem:[#allocation9 + $0x50] sm:$0xff]  ;;  %v552_v39 = vld [vmem:[#allocation9 + $0x28] sm:$0xff] }
 0x246   : > { %491 = vadd.xlane.f32.xlu1 %v490_v43  ;;  %494 = vadd.xlane.f32.xlu0 %v493_v44  ;;  %v554_v43 = vld [vmem:[#allocation9 + $0x38] sm:$0xff] }
 0x247   : > { %v562_v44 = vld [vmem:[#allocation9 + $0x78] sm:$0xff] }
 0x24a   : > { %545 = vadd.xlane.f32.xlu1 %v544_v47  ;;  %v561_v47 = vld [vmem:[#allocation9 + $0x70] sm:$0xff] }
 0x24e   : > { %497 = vadd.xlane.f32.xlu1 %v1957_v46 }
 0x29b   : > { %v501_v50 = vpop.xlane.xlu1 %500  ;;  %v453_v51 = vpop.xlane.xlu0 %452 }
 0x29f   : > { %v504_v52 = vpop.xlane.xlu1 %503  ;;  %v507_v53 = vpop.xlane.xlu0 %506 }
 0x2a0   : > { %v1078_v54 = vpack.c.bf16 %v504_v52, %v501_v50  ;;  %v563_v50 = vld [vmem:[#allocation11] sm:$0xff] }
 0x2a1   : > { %v567_v52 = vld [vmem:[#allocation11 + $0x20] sm:$0xff] }
 0x2a2   : > { %1079 = vmatprep.subr.bf16.mxu0 %v1078_v54  ;;  %1110 = vmatprep.subr.bf16.mxu1 %v1078_v54 }
 0x2a3   : > { %v456_v55 = vpop.xlane.xlu1 %455  ;;  %v459_v15 = vpop.xlane.xlu0 %458 }
 0x2a4   : > { %v1080_v56 = vpack.c.bf16 %v456_v55, %v453_v51 }
 0x2a6   : > { %1081 = vmatpush3.bf16.msra.mxu0 %v1080_v56  ;;  %1118 = vmatpush3.bf16.msra.mxu1 %v1080_v56 }
 0x2a7   : > { %v510_v57 = vpop.xlane.xlu1 %509  ;;  %v513_v58 = vpop.xlane.xlu0 %512 }
 0x2a8   : > { %v1082_v59 = vpack.c.bf16 %v510_v57, %v507_v53 }
 0x2aa   : > { %1083 = vmatprep.subr.bf16.mxu0 %v1082_v59  ;;  %1111 = vmatprep.subr.bf16.mxu1 %v1082_v59  ;;  %v564_v59 = vld [vmem:[#allocation11 + $0x8] sm:$0xff] }
 0x2ab   : > { %v462_v46 = vpop.xlane.xlu1 %461  ;;  %v465_v60 = vpop.xlane.xlu0 %464 }
 0x2ac   : > { %v1084_v61 = vpack.c.bf16 %v462_v46, %v459_v15 }
 0x2ae   : > { %1085 = vmatpush3.bf16.msra.mxu0 %v1084_v61  ;;  %1119 = vmatpush3.bf16.msra.mxu1 %v1084_v61 }
 0x2af   : > { %v516_v62 = vpop.xlane.xlu1 %515  ;;  %v519_v63 = vpop.xlane.xlu0 %518 }
 0x2b0   : > { %v1086_v0 = vpack.c.bf16 %v516_v62, %v513_v58 }
 0x2b2   : > { %1087 = vmatprep.subr.bf16.mxu0 %v1086_v0  ;;  %1112 = vmatprep.subr.bf16.mxu1 %v1086_v0 }
 0x2b3   : > { %v468_v1 = vpop.xlane.xlu1 %467  ;;  %v471_v2 = vpop.xlane.xlu0 %470 }
 0x2b4   : > { %v1088_v3 = vpack.c.bf16 %v468_v1, %v465_v60  ;;  %v568_v60 = vld [vmem:[#allocation11 + $0x28] sm:$0xff] }
 0x2b6   : > { %1089 = vmatpush3.bf16.msra.mxu0 %v1088_v3  ;;  %1120 = vmatpush3.bf16.msra.mxu1 %v1088_v3 }
 0x2b7   : > { %v522_v4 = vpop.xlane.xlu1 %521  ;;  %v525_v5 = vpop.xlane.xlu0 %524 }
 0x2b8   : > { %v1090_v6 = vpack.c.bf16 %v522_v4, %v519_v63  ;;  %v565_v4 = vld [vmem:[#allocation11 + $0x10] sm:$0xff] }
 0x2ba   : > { %1091 = vmatprep.subr.bf16.mxu0 %v1090_v6  ;;  %1113 = vmatprep.subr.bf16.mxu1 %v1090_v6  ;;  %v569_v6 = vld [vmem:[#allocation11 + $0x30] sm:$0xff] }
 0x2bb   : > { %v474_v7 = vpop.xlane.xlu1 %473  ;;  %v477_v8 = vpop.xlane.xlu0 %476 }
 0x2bc   : > { %v1092_v9 = vpack.c.bf16 %v474_v7, %v471_v2 }
 0x2be   : > { %1093 = vmatpush3.bf16.msra.mxu0 %v1092_v9  ;;  %1121 = vmatpush3.bf16.msra.mxu1 %v1092_v9 }
 0x2bf   : > { %v528_v10 = vpop.xlane.xlu1 %527  ;;  %v531_v11 = vpop.xlane.xlu0 %530 }
 0x2c0   : > { %v1094_v12 = vpack.c.bf16 %v528_v10, %v525_v5 }
 0x2c2   : > { %1095 = vmatprep.subr.bf16.mxu0 %v1094_v12  ;;  %1114 = vmatprep.subr.bf16.mxu1 %v1094_v12 }
 0x2c3   : > { %v480_v13 = vpop.xlane.xlu1 %479  ;;  %v483_v14 = vpop.xlane.xlu0 %482 }
 0x2c4   : > { %v1096_v16 = vpack.c.bf16 %v480_v13, %v477_v8 }
 0x2c6   : > { %1097 = vmatpush3.bf16.msra.mxu0 %v1096_v16  ;;  %1122 = vmatpush3.bf16.msra.mxu1 %v1096_v16 }
 0x2c7   : > { %v534_v17 = vpop.xlane.xlu1 %533  ;;  %v537_v19 = vpop.xlane.xlu0 %536 }
 0x2c8   : > { %v1098_v18 = vpack.c.bf16 %v534_v17, %v531_v11  ;;  %v570_v17 = vld [vmem:[#allocation11 + $0x38] sm:$0xff] }
 0x2ca   : > { %1099 = vmatprep.subr.bf16.mxu0 %v1098_v18  ;;  %1115 = vmatprep.subr.bf16.mxu1 %v1098_v18 }
 0x2cb   : > { %v486_v20 = vpop.xlane.xlu1 %485  ;;  %v489_v22 = vpop.xlane.xlu0 %488 }
 0x2cc   : > { %v1100_v21 = vpack.c.bf16 %v486_v20, %v483_v14  ;;  %v566_v14 = vld [vmem:[#allocation11 + $0x18] sm:$0xff] }
 0x2ce   : > { %1101 = vmatpush3.bf16.msra.mxu0 %v1100_v21  ;;  %1123 = vmatpush3.bf16.msra.mxu1 %v1100_v21 }
 0x2cf   : > { %v540_v23 = vpop.xlane.xlu1 %539  ;;  %v543_v27 = vpop.xlane.xlu0 %542 }
 0x2d0   : > { %v1102_v24 = vpack.c.bf16 %v540_v23, %v537_v19 }
 0x2d2   : > { %1103 = vmatprep.subr.bf16.mxu0 %v1102_v24  ;;  %1116 = vmatprep.subr.bf16.mxu1 %v1102_v24 }
 0x2d3   : > { %v492_v25 = vpop.xlane.xlu1 %491  ;;  %v495_v30 = vpop.xlane.xlu0 %494 }
 0x2d4   : > { %v1104_v26 = vpack.c.bf16 %v492_v25, %v489_v22 }
 0x2d6   : > { %1105 = vmatpush3.bf16.msra.mxu0 %v1104_v26  ;;  %1124 = vmatpush3.bf16.msra.mxu1 %v1104_v26 }
 0x2d7   : > { %v546_v28 = vpop.xlane.xlu1 %545 }
 0x2d8   : > { %v1106_v29 = vpack.c.bf16 %v546_v28, %v543_v27 }
 0x2da   : > { %1107 = vmatprep.subr.bf16.mxu0 %v1106_v29  ;;  %1117 = vmatprep.subr.bf16.mxu1 %v1106_v29 }
 0x2db   : > { %v498_v31 = vpop.xlane.xlu1 %497 }
 0x2dc   : > { %v1108_v32 = vpack.c.bf16 %v498_v31, %v495_v30 }
 0x2de   : > { %1109 = vmatpush3.bf16.msra.mxu0 %v1108_v32  ;;  %1125 = vmatpush3.bf16.msra.mxu1 %v1108_v32 }
 0x2e1   : > { %636 = vmatmul.mubr.f32.vlgmr.msra.gmra.mrb[0].mxu0 %v547_v33  ;;  %656 = vmatmul.mubr.f32.vlgmr.msra.gmra.mrb[0].mxu1 %v555_v34 }
 0x2e2   : > { %640 = vmatprep.mubr.f32.mxu0 %v550_v35  ;;  %660 = vmatprep.mubr.f32.mxu1 %v558_v36 }
 0x2e5   : > { %641 = vmatmul.mubr.f32.gmra.mrb[2].mxu0 %v549_v37  ;;  %661 = vmatmul.mubr.f32.gmra.mrb[2].mxu1 %v557_v38 }
 0x2e6   : > { %645 = vmatprep.mubr.f32.mxu0 %v552_v39  ;;  %665 = vmatprep.mubr.f32.mxu1 %v560_v40 }
 0x2e9   : > { %646 = vmatmul.mubr.f32.gmra.mrb[4].mxu0 %v551_v41  ;;  %666 = vmatmul.mubr.f32.gmra.mrb[4].mxu1 %v559_v42 }
 0x2ea   : > { %650 = vmatprep.mubr.f32.mxu0 %v554_v43  ;;  %670 = vmatprep.mubr.f32.mxu1 %v562_v44 }
 0x2ed   : > { %651 = vmatmul.mubr.f32.gmra.mrb[6].mxu0 %v553_v45  ;;  %671 = vmatmul.mubr.f32.gmra.mrb[6].mxu1 %v561_v47 }
 0x3b4   : > { %v1054_v48 = vpop.f32.mrb[0].mxu0  ;;  %v1066_v49 = vpop.f32.mrb[0].mxu1 }
 0x3b5   : > { %v1055_v51 = vpop.f32.mrb[1].mxu0  ;;  %v1067_v53 = vpop.f32.mrb[1].mxu1 }
 0x3b6   : > { %v1056_v54 = vadd.f32 %v1055_v51, %v1054_v48  ;;  %v1068_v55 = vadd.f32 %v1067_v53, %v1066_v49 }
 0x3b8   : > { %v638_v15 = vadd.f32 %v1056_v54, %v563_v50  ;;  %v658_v56 = vadd.f32 %v1068_v55, %v567_v52  ;;  %v1057_v57 = vpop.f32.mrb[2].mxu0  ;;  %v1069_v58 = vpop.f32.mrb[2].mxu1 }
 0x3b9   : > { %v1058_v46 = vpop.f32.mrb[3].mxu0  ;;  %v1070_v61 = vpop.f32.mrb[3].mxu1 }
 0x3ba   : > { %677 = vst.msk [vmem:[#allocation2] sm:$0xff] %vm676_vm2, %v638_v15  ;;  %681 = vst.msk [vmem:[#allocation2 + $0x20] sm:$0xff] %vm676_vm2, %v658_v56  ;;  %v1059_v62 = vadd.f32 %v1058_v46, %v1057_v57  ;;  %v1071_v63 = vadd.f32 %v1070_v61, %v1069_v58 }
 0x3bc   : > { %v643_v0 = vadd.f32 %v1059_v62, %v564_v59  ;;  %v663_v1 = vadd.f32 %v1071_v63, %v568_v60  ;;  %v1060_v2 = vpop.f32.mrb[4].mxu0  ;;  %v1072_v3 = vpop.f32.mrb[4].mxu1 }
 0x3bd   : > { %v1061_v5 = vpop.f32.mrb[5].mxu0  ;;  %v1073_v7 = vpop.f32.mrb[5].mxu1 }
 0x3be   : > { %678 = vst.msk [vmem:[#allocation2 + $0x8] sm:$0xff] %vm676_vm2, %v643_v0  ;;  %682 = vst.msk [vmem:[#allocation2 + $0x28] sm:$0xff] %vm676_vm2, %v663_v1  ;;  %v1062_v8 = vadd.f32 %v1061_v5, %v1060_v2  ;;  %v1074_v9 = vadd.f32 %v1073_v7, %v1072_v3 }
 0x3c0   : > { %v648_v10 = vadd.f32 %v1062_v8, %v565_v4  ;;  %v668_v11 = vadd.f32 %v1074_v9, %v569_v6  ;;  %v1063_v12 = vpop.f32.mrb[6].mxu0  ;;  %v1075_v13 = vpop.f32.mrb[6].mxu1 }
 0x3c1   : > { %v1064_v16 = vpop.f32.mrb[7].mxu0  ;;  %v1076_v18 = vpop.f32.mrb[7].mxu1 }
 0x3c2   : > { %679 = vst.msk [vmem:[#allocation2 + $0x10] sm:$0xff] %vm676_vm2, %v648_v10  ;;  %683 = vst.msk [vmem:[#allocation2 + $0x30] sm:$0xff] %vm676_vm2, %v668_v11  ;;  %v1065_v19 = vadd.f32 %v1064_v16, %v1063_v12  ;;  %v1077_v20 = vadd.f32 %v1076_v18, %v1075_v13 }
 0x3c4   : > { %v653_v21 = vadd.f32 %v1065_v19, %v566_v14  ;;  %v673_v22 = vadd.f32 %v1077_v20, %v570_v17 }
 0x3c6   : > { %680 = vst.msk [vmem:[#allocation2 + $0x18] sm:$0xff] %vm676_vm2, %v653_v21  ;;  %684 = vst.msk [vmem:[#allocation2 + $0x38] sm:$0xff] %vm676_vm2, %v673_v22 }
 0x3c7 PF: > { %v685_v24 = vld [vmem:[#allocation2] sm:$0xff]  ;;  %v1570_v25 = vmov 0   ;;  %v686_v27 = vld [vmem:[#allocation2 + $0x8] sm:$0xff]  ;;  %v703_v34 = vld [vmem:[%s1909_s5 + $0x50] sm:$0xff]  ;;  %s2230_s29 = sld [smem:[#allocation19_spill]]  ;;  %s2231_s8 = sld [smem:[#allocation20_spill]] }
 0x3c8   : > { %1275 = vset.pattern.permute.xlu1 %v1570_v25  ;;  %1274 = vset.pattern.permute.xlu0 %v1570_v25  ;;  %v690_v28 = vld [vmem:[#allocation2 + $0x28] sm:$0xff]  ;;  %v689_v29 = vld [vmem:[#allocation2 + $0x20] sm:$0xff]  ;;  %v695_v38 = vld [vmem:[%s1909_s5 + $0x10] sm:$0xff]  ;;  %s845_s21 = sshll.u32 %s1919_s7, 4  ;;  %s2232_s24 = sld [smem:[#allocation26_spill]]  ;;  %s2098_s21 = int_to_ptr.vmem [resolvable:$true] %s845_s21 }
 0x3c9   : > { %v687_v23 = vld [vmem:[#allocation2 + $0x10] sm:$0xff]  ;;  %727 = vperm.xlu0 %1274, %v685_v24   ;;  %v701_v32 = vld [vmem:[%s1909_s5 + $0x40] sm:$0xff]  ;;  %v704_v35 = vld [vmem:[%s1909_s5 + $0x58] sm:$0xff]  ;;  %s2234_s18 = sld [smem:[#allocation22_spill]]  ;;  %s2110_s11 = scalar_lea.sflag [#allocation5], %s315_s28 }
 0x3ca   : > { %737 = vperm.xlu1 %1275, %v687_v23   ;;  %v691_v31 = vld [vmem:[#allocation2 + $0x30] sm:$0xff]  ;;  %v693_v36 = vld [vmem:[%s1909_s5] sm:$0xff]  ;;  %v696_v39 = vld [vmem:[%s1909_s5 + $0x18] sm:$0xff]  ;;  %s1571_s17 = smov [#allocation12]  }
 0x3cb   : > { %v702_v33 = vld [vmem:[%s1909_s5 + $0x48] sm:$0xff]  ;;  %v705_v47 = vld [vmem:[%s1909_s5 + $0x60] sm:$0xff]  ;;  %v707_v53 = vld [vmem:[%s1909_s5 + $0x70] sm:$0xff] }
 0x3cc   : > { %v694_v37 = vld [vmem:[%s1909_s5 + $0x8] sm:$0xff]  ;;  %v708_v54 = vld [vmem:[%s1909_s5 + $0x78] sm:$0xff]  ;;  %v697_v55 = vld [vmem:[%s1909_s5 + $0x20] sm:$0xff] }
 0x3cd   : > { %v688_v26 = vld [vmem:[#allocation2 + $0x18] sm:$0xff]  ;;  %732 = vperm.xlu0 %1274, %v686_v27   ;;  %v706_v48 = vld [vmem:[%s1909_s5 + $0x68] sm:$0xff]  ;;  %s1016_s9 = sshll.u32 %s2230_s29, 2  ;;  %s1017_s15 = sshll.u32 %s2231_s8, 6  ;;  %v713_v63 = vld [vmem:[%s1909_s5 + $0xa0] sm:$0xff] }
 0x3ce   : > { %742 = vperm.xlu1 %1275, %v688_v26   ;;  %v692_v30 = vld [vmem:[#allocation2 + $0x38] sm:$0xff]  ;;  %v698_v15 = vld [vmem:[%s1909_s5 + $0x28] sm:$0xff]  ;;  %v709_v7 = vld [vmem:[%s1909_s5 + $0x80] sm:$0xff]  ;;  %s2062_s13 = sadd.s32 %s1017_s15, %s1016_s9  ;;  %s2233_s3 = smov %s2232_s24 }
 0x3cf   : > { %v699_v56 = vld [vmem:[%s1909_s5 + $0x30] sm:$0xff]  ;;  %v700_v57 = vld [vmem:[%s1909_s5 + $0x38] sm:$0xff]  ;;  %v714_v0 = vld [vmem:[%s1909_s5 + $0xa8] sm:$0xff]  ;;  %s1018_s14 = sshll.u32 %s2062_s13, 7  ;;  %p2235_p8 = scmp.ne.s32.totalorder %s2234_s18, 0 }
 0x3d0   : > { %v715_v5 = vld [vmem:[%s1909_s5 + $0xb0] sm:$0xff]  ;;  %v716_v6 = vld [vmem:[%s1909_s5 + $0xb8] sm:$0xff]  ;;  %v710_v8 = vld [vmem:[%s1909_s5 + $0x88] sm:$0xff]  ;;  %s2096_s25 = scalar_lea.hbm %s2232_s24, %s1018_s14  ;;  %s1426_s29 = sshll.u32 %s1571_s17, 4  ;;  %s1427_s29 = int_to_ptr.vmem [resolvable:$false] %s1426_s29 }
 0x3d1   : > { %747 = vperm.xlu0 %1274, %v689_v29   ;;  %v711_v9 = vld [vmem:[%s1909_s5 + $0x90] sm:$0xff]  ;;  %v712_v10 = vld [vmem:[%s1909_s5 + $0x98] sm:$0xff]  ;;  %v721_v18 = vld [vmem:[%s1909_s5 + $0xe0] sm:$0xff]  ;;  %s1428_s8 = scalar_lea.vmem %s1427_s29, 8192  ;;  %p1429_p11 = scmp.lt.s32.totalorder %s2098_s21, %s1427_s29 }
 0x3d2   : > { %752 = vperm.xlu1 %1275, %v690_v28   ;;  %v722_v19 = vld [vmem:[%s1909_s5 + $0xe8] sm:$0xff]  ;;  %v723_v24 = vld [vmem:[%s1909_s5 + $0xf0] sm:$0xff]  ;;  %v724_v25 = vld [vmem:[%s1909_s5 + $0xf8] sm:$0xff] }
 0x3d3   : > { %v717_v26 = vld [vmem:[%s1909_s5 + $0xc0] sm:$0xff]  ;;  %v718_v27 = vld [vmem:[%s1909_s5 + $0xc8] sm:$0xff]  ;;  %v719_v28 = vld [vmem:[%s1909_s5 + $0xd0] sm:$0xff] }
 0x3d4   : > { %v720_v29 = vld [vmem:[%s1909_s5 + $0xd8] sm:$0xff]  ;;  %s1422_s5 = scalar_lea.vmem %s2098_s21, 4096 }
 0x3d5   : > { %757 = vperm.xlu0 %1274, %v691_v31   ;;  %p1423_p0 = scmp.ne.s32.totalorder %s2098_s21, %s1422_s5  ;;  %p1430_p3 = scmp.lt.s32.totalorder %s1428_s8, %s1422_s5 }
 0x3d6   : > { %762 = vperm.xlu1 %1275, %v692_v30  }
 0x3d7   : > { %p1424_p10 = pnand %p1423_p0, %p2235_p8  ;;  %p1431_p12 = por %p1430_p3, %p1429_p11 }
 0x3d9   : > { %p1425_p6 = pneg %p1424_p10 }
 0x3db   : > { %p1432_p5 = pnand %p1431_p12, %p1425_p6 }
 0x448   : > { %v728_v41 = vpop.permute.xlu0 %727 }
 0x449   : > { %v738_v40 = vpop.permute.xlu1 %737  ;;  %v765_v49 = vmul.f32 %v728_v41, %v693_v36  ;;  %v766_v50 = vmul.f32 %v728_v41, %v694_v37  ;;  %v767_v51 = vmul.f32 %v728_v41, %v695_v38  ;;  %v768_v52 = vmul.f32 %v728_v41, %v696_v39 }
 0x44a   : > { %v773_v42 = vmul.f32 %v738_v40, %v701_v32  ;;  %v774_v43 = vmul.f32 %v738_v40, %v702_v33  ;;  %v775_v44 = vmul.f32 %v738_v40, %v703_v34  ;;  %v776_v45 = vmul.f32 %v738_v40, %v704_v35 }
 0x44b   : > { %797 = vst [vmem:[%s1919_s7] sm:$0xff] %v765_v49  ;;  %798 = vst [vmem:[%s1919_s7 + $0x8] sm:$0xff] %v766_v50 }
 0x44c   : > { %805 = vst [vmem:[%s1919_s7 + $0x40] sm:$0xff] %v773_v42  ;;  %806 = vst [vmem:[%s1919_s7 + $0x48] sm:$0xff] %v774_v43  ;;  %v733_v59 = vpop.permute.xlu0 %732 }
 0x44d   : > { %807 = vst [vmem:[%s1919_s7 + $0x50] sm:$0xff] %v775_v44  ;;  %808 = vst [vmem:[%s1919_s7 + $0x58] sm:$0xff] %v776_v45  ;;  %v743_v58 = vpop.permute.xlu1 %742  ;;  %v769_v1 = vmul.f32 %v733_v59, %v697_v55  ;;  %v770_v2 = vmul.f32 %v733_v59, %v698_v15  ;;  %v771_v3 = vmul.f32 %v733_v59, %v699_v56 }
 0x44e   : > { %799 = vst [vmem:[%s1919_s7 + $0x10] sm:$0xff] %v767_v51  ;;  %800 = vst [vmem:[%s1919_s7 + $0x18] sm:$0xff] %v768_v52  ;;  %v777_v46 = vmul.f32 %v743_v58, %v705_v47  ;;  %v778_v60 = vmul.f32 %v743_v58, %v706_v48  ;;  %v779_v61 = vmul.f32 %v743_v58, %v707_v53 }
 0x44f   : > { %v780_v62 = vmul.f32 %v743_v58, %v708_v54  ;;  %v772_v4 = vmul.f32 %v733_v59, %v700_v57  ;;  %801 = vst [vmem:[%s1919_s7 + $0x20] sm:$0xff] %v769_v1  ;;  %802 = vst [vmem:[%s1919_s7 + $0x28] sm:$0xff] %v770_v2 }
 0x450   : > { %809 = vst [vmem:[%s1919_s7 + $0x60] sm:$0xff] %v777_v46  ;;  %810 = vst [vmem:[%s1919_s7 + $0x68] sm:$0xff] %v778_v60  ;;  %v748_v12 = vpop.permute.xlu0 %747 }
 0x451   : > { %811 = vst [vmem:[%s1919_s7 + $0x70] sm:$0xff] %v779_v61  ;;  %812 = vst [vmem:[%s1919_s7 + $0x78] sm:$0xff] %v780_v62  ;;  %v753_v11 = vpop.permute.xlu1 %752  ;;  %v781_v20 = vmul.f32 %v748_v12, %v709_v7  ;;  %v782_v21 = vmul.f32 %v748_v12, %v710_v8  ;;  %v783_v22 = vmul.f32 %v748_v12, %v711_v9 }
 0x452   : > { %803 = vst [vmem:[%s1919_s7 + $0x30] sm:$0xff] %v771_v3  ;;  %804 = vst [vmem:[%s1919_s7 + $0x38] sm:$0xff] %v772_v4  ;;  %v785_v13 = vmul.f32 %v753_v11, %v713_v63  ;;  %v786_v14 = vmul.f32 %v753_v11, %v714_v0  ;;  %v787_v16 = vmul.f32 %v753_v11, %v715_v5 }
 0x453   : > { %v788_v17 = vmul.f32 %v753_v11, %v716_v6  ;;  %v784_v23 = vmul.f32 %v748_v12, %v712_v10  ;;  %813 = vst [vmem:[%s1919_s7 + $0x80] sm:$0xff] %v781_v20  ;;  %814 = vst [vmem:[%s1919_s7 + $0x88] sm:$0xff] %v782_v21 }
 0x454   : > { %817 = vst [vmem:[%s1919_s7 + $0xa0] sm:$0xff] %v785_v13  ;;  %818 = vst [vmem:[%s1919_s7 + $0xa8] sm:$0xff] %v786_v14  ;;  %v758_v31 = vpop.permute.xlu0 %757 }
 0x455   : > { %819 = vst [vmem:[%s1919_s7 + $0xb0] sm:$0xff] %v787_v16  ;;  %820 = vst [vmem:[%s1919_s7 + $0xb8] sm:$0xff] %v788_v17  ;;  %v763_v30 = vpop.permute.xlu1 %762  ;;  %v789_v36 = vmul.f32 %v758_v31, %v717_v26  ;;  %v790_v37 = vmul.f32 %v758_v31, %v718_v27  ;;  %v791_v38 = vmul.f32 %v758_v31, %v719_v28 }
 0x456   : > { %815 = vst [vmem:[%s1919_s7 + $0x90] sm:$0xff] %v783_v22  ;;  %816 = vst [vmem:[%s1919_s7 + $0x98] sm:$0xff] %v784_v23  ;;  %v793_v32 = vmul.f32 %v763_v30, %v721_v18  ;;  %v794_v33 = vmul.f32 %v763_v30, %v722_v19  ;;  %v795_v34 = vmul.f32 %v763_v30, %v723_v24 }
 0x457   : > { %v796_v35 = vmul.f32 %v763_v30, %v724_v25  ;;  %v792_v39 = vmul.f32 %v758_v31, %v720_v29  ;;  %821 = vst [vmem:[%s1919_s7 + $0xc0] sm:$0xff] %v789_v36  ;;  %822 = vst [vmem:[%s1919_s7 + $0xc8] sm:$0xff] %v790_v37 }
 0x458   : > { %825 = vst [vmem:[%s1919_s7 + $0xe0] sm:$0xff] %v793_v32  ;;  %826 = vst [vmem:[%s1919_s7 + $0xe8] sm:$0xff] %v794_v33 }
 0x459   : > { %827 = vst [vmem:[%s1919_s7 + $0xf0] sm:$0xff] %v795_v34  ;;  %828 = vst [vmem:[%s1919_s7 + $0xf8] sm:$0xff] %v796_v35 }
 0x45a   : > { %823 = vst [vmem:[%s1919_s7 + $0xd0] sm:$0xff] %v791_v38  ;;  %824 = vst [vmem:[%s1919_s7 + $0xd8] sm:$0xff] %v792_v39 }
 0x45b   : > { %1435 = shalt.err (!%p1432_p5)
}
 0x45c   : > { %s1436_s28 = scalar_lea.hbm %s2096_s25, 4096  ;;  %s1440_s15 = scalar_lea.hbm %s2233_s3, 16384 }
 0x45d   : > { %p1437_p2 = scmp.ne.s32.totalorder %s2096_s25, %s1436_s28  ;;  %p1441_p13 = scmp.lt.u32.totalorder %s2096_s25, %s2233_s3 }
 0x45e   : > { %p1442_p7 = scmp.lt.u32.totalorder %s1440_s15, %s1436_s28  ;;  %p1444_p0 = scmp.lt.u32.totalorder %s1436_s28, %s2096_s25 }
 0x45f   : > { %p1438_p4 = pnand %p1437_p2, %p2235_p8 }
 0x460   : > { %p1443_p9 = por %p1442_p7, %p1441_p13 }
 0x461   : > { %p1439_p1 = pneg %p1438_p4 }
 0x462   : > { %p1445_p10 = por %p1444_p0, %p1443_p9 }
 0x464   : > { %p1446_p6 = pnand %p1445_p10, %p1439_p1 }
 0x466   : > { %1449 = shalt.err (!%p1446_p6)
}
 0x467   : > { %s1572_s30 = smov 512   ;;  %s1573_s16 = smov 1024  }
 0x468   : > { %s1574_s24 = smov 32  }
 0x469   : > { %1140 = dma.vmem_to_hbm [thread:$0]  (%p2235_p8), %s2098_s21, 4096, %s2096_s25, %s2110_s11, %s1572_s30, %s1573_s16, %s1574_s24  }
 0x46a PF: > { %s2236_s5 = sld [smem:[#allocation21_spill]]  ;;  %s2237_s17 = sld [smem:[#allocation18_spill]] }
 0x46b   : > { %s2238_s29 = sld [smem:[#allocation23_spill]] }
 0x470   : > { %p1168_p11 = scmp.ge.s32.totalorder %s2236_s5, 2  ;;  %s860_s8 = sand.u32 1, %s2237_s17  }
 0x471   : > { %p2239_p3 = scmp.ne.s32.totalorder %s2238_s29, 0  ;;  %s861_s28 = scalar_lea.sflag [#allocation5], %s860_s8 }
 0x473   : > { %p1160_p12 = pnand %p1168_p11, %p2239_p3 }
 0x475   : > { %1511 = dma.done.wait (!%p1160_p12), %s861_s28, 4096  }
 0x476   : > { %1513 = vsyncadd (!%p1160_p12), %s861_s28, 4294963200  ;;  %s25_s28 = sadd.s32 1, %s2236_s5   ;;  %s2240_s18 = smov %s1520_s19 }
 0x477   : > { %p22_p5 = scmp.ge.s32.totalorder %s25_s28, 6   ;;  %s2241_s19 = smov %s1524_s20 }
 0x478   : > { %s2242_s20 = smov %s1864_s6  ;;  %s2243_s21 = smov %s1532_s22 }
 0x479   : > { %s2244_s22 = smov %s1536_s23  ;;  %s2245_s23 = smov %s1859_s1 }
 0x47a   : > { %s2246_s24 = smov %s1548_s26  ;;  %s2247_s25 = smov %s1552_s27 }
 0x47b   : > { %s2248_s26 = smov %s2251_s10  ;;  %s2249_s27 = smov %s2255_s12 }
 0x47c   :  { %24 = sbr.rel (!%p22_p5) target bundleno = 16 (0x10), region = 121 }
 0x483   :  { %866 = vsyncpa [#allocation4], 1 }
 0x484   :  { %868 = vsyncpa [#allocation4 + $0x1], 1 }
 0x485   :  { %869 = vsyncpa [#allocation7], 1 }
 0x486   :  { %871 = vsyncpa [#allocation7 + $0x1], 1 }
 0x487   :  { %872 = vsyncpa [#allocation10], 1 }
 0x488   :  { %873 = vsyncpa [#allocation5], 1 }
 0x489   :  { %875 = vsyncpa [#allocation5 + $0x1], 1 }

</bundles_post_ra>
